<compile_context>
chip_gen: v5e
topology: v5e:2x2
jax: 0.10.0
libtpu: 0.0.40
codegen_flags: <defaults>
</compile_context>

<pallas_src>
import functools

import jax
import jax.numpy as jnp
from jax.experimental import pallas as pl
from jax.experimental.pallas import tpu as pltpu

# ----------------------------- config ("cf") ---------------------------------
BATCH_SIZE = 2
NODE_EMB_DIM = 32          # cf.node_embedding_dim
RVNN_DIM = 32              # cf.RvNN_input_dim   (encode_dim of sub-tree encoder)
AGG_DIM = 32               # cf.aggregate_dim    (encode_dim of rebuild encoder)
AST_VOCAB = 50             # cf.ast_vocab_size
CODE_VOCAB = 60            # cf.code_vocab_size
CODE_EMB_DIM = 32          # cf.code_embedding_dim
HIDDEN = 32                # cf.code_gru_hidden_size == cf.decoder_rnn_hidden_size
SUM_VOCAB = 40             # cf.summary_vocab_size
SUM_EMB_DIM = 32           # cf.summary_embedding_dim
VPAD = 128                 # lane-dense padded vocab for decoder logits
GRU_TB = 8                 # GRU time steps per grid iteration


# ----------------------------- small Pallas helpers --------------------------
def _linear_kernel(x_ref, wt_ref, b_ref, o_ref):
    # y = x @ Wt + b  (Wt pre-transposed: (in, out); b: (1, out))
    o_ref[...] = (
        jnp.dot(x_ref[...], wt_ref[...], preferred_element_type=jnp.float32)
        + b_ref[...]
    )


def pallas_linear_t(x, wt, b_row):
    """x: (N, in), wt: (in, out) pre-transposed, b_row: (1, out) -> (N, out)."""
    return pl.pallas_call(
        _linear_kernel,
        out_shape=jax.ShapeDtypeStruct((x.shape[0], wt.shape[1]), jnp.float32),
    )(x, wt, b_row)


def _attend(h_q, enc):
    """Dot-product attention of query (B,1,H) over enc (B,L,H) -> context (B,H).

    Softmax denominator goes through pl.reciprocal(approx=True) (EUP slot).
    NOTE: no length mask / scaling, matching the assumed original decoder; all
    batch elements share identical encoder lengths here.
    """
    s = jnp.einsum('bqh,blh->bql', h_q, enc, preferred_element_type=jnp.float32)
    m = jnp.max(s, axis=-1, keepdims=True)
    e = jnp.exp(s - m)
    a = e * pl.reciprocal(jnp.sum(e, axis=-1, keepdims=True), approx=True)
    ctx = jnp.einsum('bql,blh->bqh', a, enc, preferred_element_type=jnp.float32)
    return ctx[:, 0, :]


# ----------------------------- GRU encoder kernel ----------------------------
def _gru_block_kernel(x_ref, h0_ref, wih_ref, whh_ref, bih_ref, bhh_ref,
                      out_ref, hT_ref, h_scratch, *, tb, b, t_total, hidden):
    # Grid axis 0 = time-block (sequential recurrence; hidden carried in VMEM
    # scratch). Inputs are flattened time-major per block: x_ref is
    # (1, TB*B, E) so the hoisted input-path matmul needs no in-kernel reshape.
    pid = pl.program_id(0)
    H = hidden

    @pl.when(pid == 0)
    def _():
        h_scratch[...] = h0_ref[...]

    # Hoisted x-path: one (TB*B, E) x (E, 3H) matmul per time block (off the
    # serial chain); only h @ W_hh remains in the recurrence.
    gi = (jnp.dot(x_ref[0], wih_ref[...], preferred_element_type=jnp.float32)
          + bih_ref[...])                                    # (TB*B, 3H)
    whh = whh_ref[...]
    bhh = bhh_ref[...]

    h = h_scratch[...]
    hs = []
    for i in range(tb):                                       # static unroll
        gh = jnp.dot(h, whh, preferred_element_type=jnp.float32) + bhh   # (B, 3H)
        g = gi[i * b:(i + 1) * b, :]                                      # (B, 3H)
        r = jax.nn.sigmoid(g[:, :H] + gh[:, :H])
        z = jax.nn.sigmoid(g[:, H:2 * H] + gh[:, H:2 * H])
        n = jnp.tanh(g[:, 2 * H:] + r * gh[:, 2 * H:])
        h_new = (1.0 - z) * n + z * h
        # Mask padded time steps (keep previous hidden).
        valid = ((pid * tb + i) < t_total).astype(jnp.float32)
        h = valid * h_new + (1.0 - valid) * h
        hs.append(h)

    out_ref[0] = jnp.concatenate(hs, axis=0)   # one (TB*B, H) block store
    h_scratch[...] = h
    hT_ref[...] = h                            # resident block; final value = h_T


def pallas_gru(x_tm, h0, wih_f, whh_f, bih_row, bhh_row):
    """Single-layer GRU (PyTorch gate convention), time-blocked.

    x_tm: (T, B, E) time-major, h0: (B, H).  Returns (outputs (T,B,H), h_T (B,H)).
    Weights are fused-gate layout: wih_f (E, 3H), whh_f (H, 3H), biases (1, 3H).
    """
    T, B, E = x_tm.shape
    H = h0.shape[-1]
    n_blocks = (T + GRU_TB - 1) // GRU_TB
    T_pad = n_blocks * GRU_TB
    x_p = jnp.pad(x_tm, ((0, T_pad - T), (0, 0), (0, 0)))
    x_blk = x_p.reshape(n_blocks, GRU_TB * B, E)   # (block, time-major rows, E)

    kernel = functools.partial(_gru_block_kernel, tb=GRU_TB, b=B,
                               t_total=T, hidden=H)
    out_blk, hT = pl.pallas_call(
        kernel,
        grid=(n_blocks,),
        in_specs=[
            pl.BlockSpec((1, GRU_TB * B, E), lambda t: (t, 0, 0)),
            pl.BlockSpec((B, H), lambda t: (0, 0)),
            pl.BlockSpec((E, 3 * H), lambda t: (0, 0)),
            pl.BlockSpec((H, 3 * H), lambda t: (0, 0)),
            pl.BlockSpec((1, 3 * H), lambda t: (0, 0)),
            pl.BlockSpec((1, 3 * H), lambda t: (0, 0)),
        ],
        out_specs=[
            pl.BlockSpec((1, GRU_TB * B, H), lambda t: (t, 0, 0)),
            pl.BlockSpec((B, H), lambda t: (0, 0)),
        ],
        out_shape=[
            jax.ShapeDtypeStruct((n_blocks, GRU_TB * B, H), jnp.float32),
            jax.ShapeDtypeStruct((B, H), jnp.float32),
        ],
        scratch_shapes=[pltpu.VMEM((B, H), jnp.float32)],
        compiler_params=pltpu.CompilerParams(dimension_semantics=("arbitrary",)),
    )(x_blk, h0, wih_f, whh_f, bih_row, bhh_row)
    out_tm = out_blk.reshape(T_pad, B, H)[:T]
    return out_tm, hT


# ----------------------------- fused decoder kernels -------------------------
def _decoder_teacher_kernel(emb_ref, h0_ref, ast_ref, code_ref,
                            wih_ref, whh_ref, bih_ref, bhh_ref,
                            wo_ref, bo_ref,
                            logits_ref, hlast_ref, *, t_dec, b, hidden):
    # Single invocation (no grid): everything VMEM-resident for the whole decode.
    H = hidden
    # Teacher forcing: all inputs known ahead -> hoist the whole input path
    # into one (T_dec*B, Es) x (Es, 3H) matmul.
    gi_all = (jnp.dot(emb_ref[...], wih_ref[...], preferred_element_type=jnp.float32)
              + bih_ref[...])                               # (T_dec*B, 3H)
    enc_ast = ast_ref[...]                                  # (B, L_ast, H)
    enc_code = code_ref[...]                                # (B, L_code, H)
    whh = whh_ref[...]
    bhh = bhh_ref[...]
    wo = wo_ref[...]
    bo = bo_ref[...]

    h = h0_ref[...]
    for t in range(t_dec):                                  # static unroll
        gh = jnp.dot(h, whh, preferred_element_type=jnp.float32) + bhh   # (B, 3H)
        g = gi_all[t * b:(t + 1) * b, :]                                  # (B, 3H)
        r = jax.nn.sigmoid(g[:, :H] + gh[:, :H])
        z = jax.nn.sigmoid(g[:, H:2 * H] + gh[:, H:2 * H])
        n = jnp.tanh(g[:, 2 * H:] + r * gh[:, 2 * H:])
        h = (1.0 - z) * n + z * h

        h_q = h[:, None, :]
        ctx_ast = _attend(h_q, enc_ast)
        ctx_code = _attend(h_q, enc_code)
        # One output dot over the lane-concatenated features (B, 3H) x (3H, 128).
        feat = jnp.concatenate([h, ctx_ast, ctx_code], axis=-1)
        logits_ref[t] = (jnp.dot(feat, wo, preferred_element_type=jnp.float32) + bo)
    hlast_ref[...] = h


def pallas_decoder_teacher(emb_flat, h0, ast_out, code_out, pp):
    """Teacher-forced decode in ONE pallas_call. emb_flat: (T_dec*B, Es) time-major."""
    B, H = h0.shape
    t_dec = emb_flat.shape[0] // B
    kernel = functools.partial(_decoder_teacher_kernel, t_dec=t_dec, b=B, hidden=H)
    logits_pad, h_last = pl.pallas_call(
        kernel,
        out_shape=[
            jax.ShapeDtypeStruct((t_dec, B, VPAD), jnp.float32),
            jax.ShapeDtypeStruct((B, H), jnp.float32),
        ],
    )(emb_flat, h0, ast_out, code_out,
      pp["dec_wih_f"], pp["dec_whh_f"], pp["dec_bih_row"], pp["dec_bhh_row"],
      pp["dec_wo_cat"], pp["dec_bo_pad"])
    return logits_pad, h_last


def _decoder_greedy_kernel(onehot0_ref, h0_ref, ast_ref, code_ref, emb_tab_ref,
                           wih_ref, whh_ref, bih_ref, bhh_ref, wo_ref, bo_ref,
                           logits_ref, hlast_ref, *, t_dec, hidden, vocab):
    # Fused greedy decode: embedding lookup via one-hot matmul, in-kernel masked
    # argmax over the 128-lane padded vocab (pad lanes masked to -1e30).
    H = hidden
    enc_ast = ast_ref[...]
    enc_code = code_ref[...]
    whh = whh_ref[...]
    bhh = bhh_ref[...]
    bih = bih_ref[...]
    wo = wo_ref[...]
    bo = bo_ref[...]
    # Fold embedding lookup + input-gate projection into one table: (VPAD, 3H).
    tab_gi = jnp.dot(emb_tab_ref[...], wih_ref[...],
                     preferred_element_type=jnp.float32)

    B = onehot0_ref.shape[0]
    lane = jax.lax.broadcasted_iota(jnp.int32, (B, VPAD), 1).astype(jnp.float32)
    in_vocab = lane < float(vocab)

    h = h0_ref[...]
    onehot = onehot0_ref[...]                               # (B, VPAD)
    for t in range(t_dec):                                  # static unroll
        gi = jnp.dot(onehot, tab_gi, preferred_element_type=jnp.float32) + bih
        gh = jnp.dot(h, whh, preferred_element_type=jnp.float32) + bhh
        r = jax.nn.sigmoid(gi[:, :H] + gh[:, :H])
        z = jax.nn.sigmoid(gi[:, H:2 * H] + gh[:, H:2 * H])
        n = jnp.tanh(gi[:, 2 * H:] + r * gh[:, 2 * H:])
        h = (1.0 - z) * n + z * h

        h_q = h[:, None, :]
        ctx_ast = _attend(h_q, enc_ast)
        ctx_code = _attend(h_q, enc_code)
        feat = jnp.concatenate([h, ctx_ast, ctx_code], axis=-1)
        logits = jnp.dot(feat, wo, preferred_element_type=jnp.float32) + bo
        logits_ref[t] = logits

        if t + 1 < t_dec:
            masked = jnp.where(in_vocab, logits, -1e30)
            mx = jnp.max(masked, axis=-1, keepdims=True)
            # First (lowest-index) argmax, matching torch.argmax tie-breaking.
            first = jnp.min(jnp.where(masked == mx, lane, float(VPAD)),
                            axis=-1, keepdims=True)
            onehot = (lane == first).astype(jnp.float32)
    hlast_ref[...] = h


def pallas_decoder_greedy(onehot0, h0, ast_out, code_out, t_dec, pp):
    B, H = h0.shape
    kernel = functools.partial(_decoder_greedy_kernel, t_dec=t_dec, hidden=H,
                               vocab=SUM_VOCAB)
    logits_pad, h_last = pl.pallas_call(
        kernel,
        out_shape=[
            jax.ShapeDtypeStruct((t_dec, B, VPAD), jnp.float32),
            jax.ShapeDtypeStruct((B, H), jnp.float32),
        ],
    )(onehot0, h0, ast_out, code_out, pp["summary_embedding_pad"],
      pp["dec_wih_f"], pp["dec_whh_f"], pp["dec_bih_row"], pp["dec_bhh_row"],
      pp["dec_wo_cat"], pp["dec_bo_pad"])
    return logits_pad, h_last


# ------------------- tree encoders (glue around the kernels) -----------------
def convert_rebuild_tree_to_RvNN_format(root_node, tree, tree_with_label, start_index):
    children = tree[root_node]
    for r in children:
        tree_with_label.append([r + start_index])
        if r in tree.keys():
            convert_rebuild_tree_to_RvNN_format(r, tree, tree_with_label[-1], start_index)


class WeightedTreeEncoder:
    """JAX port of WeightedBatchTreeEncoder (activation='relu', node_combine='max').

    Tree recursion is a static Python structure (unrolls at trace time).
    W_c is pre-applied to the whole embedding table (rows then gathered);
    W_sum is applied once per recursion node to the concatenated child results
    with plain jnp.dot so XLA fuses it with the scatter glue (per perf review:
    no per-tree-node pallas_call dispatch).  Correctness note: W_c(0)=b_c and
    W_sum(0)=b_sum, so the padded rows of the original scatter+linear are
    reproduced via the bias broadcasts below.
    """

    def __init__(self, proj_table, bc_row, wsum_t, bsum_row, encode_dim):
        self.proj_table = proj_table     # embedding @ W_c.T + b_c   (rows, encode_dim)
        self.bc_row = bc_row             # (1, encode_dim)
        self.wsum_t = wsum_t             # (encode_dim, encode_dim) pre-transposed
        self.bsum_row = bsum_row         # (1, encode_dim)
        self.encode_dim = encode_dim
        self.activation = jax.nn.relu    # cf.activate_f == 'relu'
        self.node_list = []
        self.batch_node = None

    def traverse_mul(self, node, batch_index):
        size = len(node)
        if not size:
            return None
        index, children_index = [], []
        current_node, children = [], []
        for i in range(size):
            if node[i][0] != -1:
                index.append(i)
                current_node.append(node[i][0])
                temp = node[i][1:]
                for j in range(len(temp)):
                    if temp[j][0] != -1:
                        if len(children_index) <= j:
                            children_index.append([i])
                            children.append([temp[j]])
                        else:
                            children_index[j].append(i)
                            children[j].append(temp[j])
            else:
                batch_index[i] = -1

        # batch_current = W_c(scatter(embedding rows))  ==  b_c everywhere,
        # overwritten with pre-projected rows at `index`.
        batch_current = jnp.broadcast_to(self.bc_row, (size, self.encode_dim))
        if index:
            gathered = self.proj_table[jnp.asarray(current_node, jnp.int32)]
            batch_current = batch_current.at[jnp.asarray(index, jnp.int32)].set(gathered)

        # Recurse, then apply W_sum ONCE to the concatenated child results.
        child_results, child_rows = [], []
        for c in range(len(children)):
            batch_children_index = [batch_index[i] for i in children_index[c]]
            tree = self.traverse_mul(children[c], batch_children_index)
            if tree is not None:
                # Note: cf.is_avg_weighted_RvNN branch requires max(1/c_num) > 1,
                # which is impossible, so only the unweighted path is reachable.
                child_results.append(tree)
                child_rows.append(children_index[c])
        if child_results:
            cat = (jnp.concatenate(child_results, axis=0)
                   if len(child_results) > 1 else child_results[0])
            proj = jnp.dot(cat, self.wsum_t)              # fused by XLA with scatters
            # Each non-empty child group contributed b_sum to every row.
            batch_current = batch_current + float(len(child_results)) * self.bsum_row
            off = 0
            for idxs in child_rows:
                n_c = len(idxs)
                batch_current = batch_current.at[
                    jnp.asarray(idxs, jnp.int32)].add(proj[off:off + n_c])
                off += n_c

        b_in = [i for i in batch_index if i != -1]
        if len(b_in) == size:                        # mirrors the torch try/except
            node_vec = self.batch_node.at[jnp.asarray(b_in, jnp.int32)].set(batch_current)
            self.node_list.append(self.activation(node_vec))
        return batch_current

    def __call__(self, x, bs):
        self.batch_node = jnp.zeros((bs, self.encode_dim), jnp.float32)
        self.node_list = []
        self.traverse_mul(x, list(range(bs)))
        stacked = jnp.stack(self.node_list)          # (num_levels, bs, encode_dim)
        return stacked, jnp.max(stacked, axis=0)     # cf.node_combine == 'max'


def ast_encoder_forward(pp, slicedAST, rebuild_x, batch_size):
    """BatchASTEncoder.forward"""
    lens = [len(item) for item in slicedAST]
    encodes_nodes = []
    for i in range(batch_size):
        encodes_nodes.extend(slicedAST[i])

    # TODO(synk): WeightedBatchSubTreeEncoder source not provided; mirrored from
    # WeightedBatchTreeEncoder with a vocab embedding table.
    sub_enc = WeightedTreeEncoder(pp["sub_proj_table"], pp["sub_bc_row"],
                                  pp["sub_wsum_t"], pp["sub_bsum_row"], RVNN_DIM)
    _, encodes = sub_enc(encodes_nodes, sum(lens))   # (sum(lens), RVNN_DIM)

    rebuild_trees = []
    start_index = 0
    for i in range(batch_size):
        tree = rebuild_x[i]
        tree_with_label = [0 + start_index]
        convert_rebuild_tree_to_RvNN_format(0, tree, tree_with_label, start_index)
        start_index += lens[i]
        rebuild_trees.append(tree_with_label)

    # Runtime table projection for the rebuild encoder (tiny; left to XLA fusion).
    reb_proj = jnp.dot(encodes, pp["reb_wc_t"]) + pp["reb_bc_row"]
    reb_enc = WeightedTreeEncoder(reb_proj, pp["reb_bc_row"],
                                  pp["reb_wsum_t"], pp["reb_bsum_row"], AGG_DIM)
    return reb_enc(rebuild_trees, batch_size)        # ((L, B, AGG), (B, AGG))


# ----------------------------- full forward ----------------------------------
def rvnn_rvnn_ast_code_attn_forward(pp, slicedAST, rebuild_tree, summary,
                                    method_code, use_teacher=True):
    B = summary.shape[0]

    # --- AST encoder ---
    asts_encoder_output, asts_encoder_hidden = ast_encoder_forward(
        pp, slicedAST, rebuild_tree, B)
    asts_encoder_output = jnp.transpose(asts_encoder_output, (1, 0, 2))  # (B, L_ast, H)

    # --- code GRU encoder (h0 = AST encoder hidden) ---
    # TODO(synk): GRUEncoder source not provided; standard single-layer GRU assumed.
    code_emb = pp["code_embedding"][method_code]                         # (B, Tc, E)
    code_emb_tm = jnp.transpose(code_emb, (1, 0, 2))                     # (Tc, B, E)
    out_tm, h_T = pallas_gru(code_emb_tm, asts_encoder_hidden,
                             pp["enc_wih_f"], pp["enc_whh_f"],
                             pp["enc_bih_row"], pp["enc_bhh_row"])
    token_encoder_output = jnp.transpose(out_tm, (1, 0, 2))              # (B, Tc, H)

    # --- attention decoder ---
    # TODO(synk): CodeAttnGRUDecoder source not provided; standard GRUCell +
    # dot-product attention over both encoder outputs assumed.
    summary_length = summary.shape[1]
    t_dec = summary_length - 1
    decoder_hidden = h_T

    if use_teacher:
        # Teacher forcing: all inputs known ahead -> single fused kernel with the
        # input-gate path hoisted to one matmul.
        emb_seq = pp["summary_embedding"][summary[:, :t_dec]]            # (B,T-1,Es)
        emb_flat = jnp.transpose(emb_seq, (1, 0, 2)).reshape(t_dec * B, SUM_EMB_DIM)
        logits_pad, _ = pallas_decoder_teacher(emb_flat, decoder_hidden,
                                               asts_encoder_output,
                                               token_encoder_output, pp)
    else:
        # Greedy decoding: one fused kernel, in-kernel masked argmax + one-hot
        # embedding lookup; encoder outputs / weights stay VMEM-resident.
        onehot0 = jax.nn.one_hot(summary[:, 0], VPAD, dtype=jnp.float32)
        logits_pad, _ = pallas_decoder_greedy(onehot0, decoder_hidden,
                                              asts_encoder_output,
                                              token_encoder_output, t_dec, pp)

    return jnp.transpose(logits_pad[:, :, :SUM_VOCAB], (1, 0, 2))        # (B,T-1,V)


# ----------------------------- parameters ------------------------------------
def make_params(key):
    ks = jax.random.split(key, 20)

    def p(k, shape, scale=0.1):
        return (scale * jax.random.normal(k, shape)).astype(jnp.float32)

    return {
        "ast_embedding": p(ks[0], (AST_VOCAB, NODE_EMB_DIM)),
        "sub_wc": p(ks[1], (RVNN_DIM, NODE_EMB_DIM)),
        "sub_bc": p(ks[2], (RVNN_DIM,)),
        "sub_wsum": p(ks[3], (RVNN_DIM, RVNN_DIM)),
        "sub_bsum": p(ks[4], (RVNN_DIM,)),
        "reb_wc": p(ks[5], (AGG_DIM, RVNN_DIM)),
        "reb_bc": p(ks[6], (AGG_DIM,)),
        "reb_wsum": p(ks[7], (AGG_DIM, AGG_DIM)),
        "reb_bsum": p(ks[8], (AGG_DIM,)),
        "code_embedding": p(ks[9], (CODE_VOCAB, CODE_EMB_DIM)),
        "enc_wih": p(ks[10], (3 * HIDDEN, CODE_EMB_DIM)),
        "enc_whh": p(ks[11], (3 * HIDDEN, HIDDEN)),
        "enc_bih": p(ks[12], (3 * HIDDEN,)),
        "enc_bhh": p(ks[13], (3 * HIDDEN,)),
        "summary_embedding": p(ks[14], (SUM_VOCAB, SUM_EMB_DIM)),
        "dec_wih": p(ks[15], (3 * HIDDEN, SUM_EMB_DIM)),
        "dec_whh": p(ks[16], (3 * HIDDEN, HIDDEN)),
        "dec_bih": p(ks[17], (3 * HIDDEN,)),
        "dec_bhh": p(ks[18], (3 * HIDDEN,)),
        "dec_wout": p(ks[19], (SUM_VOCAB, 3 * HIDDEN)),
        "dec_bout": jnp.zeros((SUM_VOCAB,), jnp.float32),
    }


def prepare_params(params):
    """One-time param prep: fused-gate transposed weights (In, 3H), lane-padded
    output projection, pre-projected AST table, padded summary embedding."""
    def fused_t(w):           # torch (3H, In) with [r|z|n] row blocks -> (In, 3H)
        return jnp.transpose(w)

    def bias_row(b):          # (3H,) -> (1, 3H)
        return b.reshape(1, -1)

    v, three_h = params["dec_wout"].shape
    wo = jnp.pad(jnp.transpose(params["dec_wout"]), ((0, 0), (0, VPAD - v)))  # (3H,VPAD)
    bo = jnp.pad(params["dec_bout"], (0, VPAD - v)).reshape(1, VPAD)
    sum_emb_pad = jnp.pad(params["summary_embedding"],
                          ((0, VPAD - SUM_VOCAB), (0, 0)))                    # (VPAD,Es)

    return {
        # sub-tree encoder: W_c applied to the whole vocab table once (Pallas).
        "sub_proj_table": pallas_linear_t(params["ast_embedding"],
                                          params["sub_wc"].T,
                                          params["sub_bc"].reshape(1, -1)),
        "sub_bc_row": params["sub_bc"].reshape(1, -1),
        "sub_wsum_t": params["sub_wsum"].T,
        "sub_bsum_row": params["sub_bsum"].reshape(1, -1),
        "reb_wc_t": params["reb_wc"].T,
        "reb_bc_row": params["reb_bc"].reshape(1, -1),
        "reb_wsum_t": params["reb_wsum"].T,
        "reb_bsum_row": params["reb_bsum"].reshape(1, -1),
        "code_embedding": params["code_embedding"],
        "enc_wih_f": fused_t(params["enc_wih"]),
        "enc_whh_f": fused_t(params["enc_whh"]),
        "enc_bih_row": bias_row(params["enc_bih"]),
        "enc_bhh_row": bias_row(params["enc_bhh"]),
        "summary_embedding": params["summary_embedding"],
        "summary_embedding_pad": sum_emb_pad,
        "dec_wih_f": fused_t(params["dec_wih"]),
        "dec_whh_f": fused_t(params["dec_whh"]),
        "dec_bih_row": bias_row(params["dec_bih"]),
        "dec_bhh_row": bias_row(params["dec_bhh"]),
        "dec_wo_cat": wo,
        "dec_bo_pad": bo,
    }


if __name__ == "__main__":
    key = jax.random.PRNGKey(0)
    pkey, skey, ckey = jax.random.split(key, 3)
    params = make_params(pkey)
    pp = prepare_params(params)

    # slicedAST: per batch item, list of sub-trees in RvNN nested-list format
    # (node-id first, then child sub-trees).  Node ids index the AST vocab.
    slicedAST = [
        [  # batch element 0: 3 sub-trees
            [3, [4], [5, [6]]],
            [7, [8]],
            [2],
        ],
        [  # batch element 1: 2 sub-trees
            [9, [10, [11]], [12]],
            [1, [3]],
        ],
    ]
    # rebuild_tree: per batch item, dict {parent_subtree_idx: [child_subtree_idx]}
    rebuild_tree = [
        {0: [1, 2]},
        {0: [1]},
    ]

    summary = jax.random.randint(skey, (BATCH_SIZE, 6), 0, SUM_VOCAB, dtype=jnp.int32)
    method_code = jax.random.randint(ckey, (BATCH_SIZE, 7), 0, CODE_VOCAB, dtype=jnp.int32)

    # Teacher-forcing path (single fused decoder kernel).
    out = rvnn_rvnn_ast_code_attn_forward(
        pp, slicedAST, rebuild_tree, summary, method_code, use_teacher=True)
    jax.block_until_ready(out)
    assert out.shape == (BATCH_SIZE, summary.shape[1] - 1, SUM_VOCAB)

    # Greedy path (single fused decoder kernel with in-kernel argmax).
    out_greedy = rvnn_rvnn_ast_code_attn_forward(
        pp, slicedAST, rebuild_tree, summary, method_code, use_teacher=False)
    jax.block_until_ready(out_greedy)
    assert out_greedy.shape == (BATCH_SIZE, summary.shape[1] - 1, SUM_VOCAB)

    print("KERNEL_OK")
</pallas_src>

<mosaic_0001>
module attributes {stable_mosaic.version = 11 : i64} {
  func.func @_linear_kernel(%arg0: memref<50x32xf32, #tpu.memory_space<vmem>>, %arg1: memref<32x32xf32, #tpu.memory_space<vmem>>, %arg2: memref<1x32xf32, #tpu.memory_space<vmem>>, %arg3: memref<50x32xf32, #tpu.memory_space<vmem>>) attributes {dimension_semantics = [], scalar_prefetch = 0 : i64, scratch_operands = 0 : i64, tpu.core_type = #tpu.core_type<tc>} {
    %c0 = arith.constant 0 : index
    %c0_0 = arith.constant 0 : index
    %0 = vector.load %arg0[%c0, %c0_0] : memref<50x32xf32, #tpu.memory_space<vmem>>, vector<50x32xf32>
    %c0_1 = arith.constant 0 : index
    %c0_2 = arith.constant 0 : index
    %1 = vector.load %arg1[%c0_1, %c0_2] : memref<32x32xf32, #tpu.memory_space<vmem>>, vector<32x32xf32>
    %cst = arith.constant dense<0.000000e+00> : vector<50x32xf32>
    %2 = tpu.matmul %0, %1, %cst {dimension_numbers = #tpu.dot_dimension_numbers<[1], [0], [0], [1], [0, 0, 1, 1], [], []>} : vector<50x32xf32>, vector<32x32xf32>, vector<50x32xf32> -> vector<50x32xf32>
    %c0_3 = arith.constant 0 : index
    %c0_4 = arith.constant 0 : index
    %3 = vector.load %arg2[%c0_3, %c0_4] : memref<1x32xf32, #tpu.memory_space<vmem>>, vector<1x32xf32>
    %4 = vector.broadcast %3 : vector<1x32xf32> to vector<50x32xf32>
    %5 = arith.addf %2, %4 : vector<50x32xf32>
    %c0_5 = arith.constant 0 : index
    %c0_6 = arith.constant 0 : index
    %6 = vector.load %arg3[%c0_5, %c0_6] : memref<50x32xf32, #tpu.memory_space<vmem>>, vector<50x32xf32>
    tpu.vector_store %arg3[%c0_5, %c0_6], %5 {strides = array<i32>} : memref<50x32xf32, #tpu.memory_space<vmem>>, vector<50x32xf32>,
    return
  }
}

</mosaic_0001>

<bundles_post_ra>
// kernel: tpu_custom_call.1
= control target key start
LH: loop header
LB: loop body
LE: loop exit
PB: predicated region body
PF: predicated region fallthrough
CT: control target
= control target key end

     0   :  { %vm29_vm0 = vcmask 261120   ;;  %vm95_vm1 = vcmask 254976   ;;  %s211_s1 = inlined_call_operand.vmem [shape: f32[32,32], index: 1, kind: input, shape index: {}]   ;;  %s212_s0 = inlined_call_operand.vmem [shape: f32[50,32], index: 0, kind: input, shape index: {}]   ;;  %s213_s2 = inlined_call_operand.vmem [shape: f32[1,32], index: 2, kind: input, shape index: {}]   ;;  %s214_s3 = inlined_call_operand.vmem [shape: f32[50,32], index: 3, kind: output, shape index: {}]  }
   0x1   :  { %v24_v0 = vld [vmem:[%s211_s1 + $0x18] sm:$0xff]  ;;  %v23_v1 = vld [vmem:[%s211_s1 + $0x10] sm:$0xff]  ;;  %v22_v2 = vld [vmem:[%s211_s1 + $0x8] sm:$0xff] }
   0x2   :  { %110 = vmatpush.msra.mxu3 %v24_v0  ;;  %63 = vmatpush.msra.mxu0 %v24_v0  ;;  %v21_v3 = vld [vmem:[%s211_s1] sm:$0xff]  ;;  %v19_v4 = vld [vmem:[%s212_s0 + $0x28] sm:$0xff]  ;;  %v16_v6 = vld [vmem:[%s212_s0 + $0x10] sm:$0xff] }
   0x3   :  { %108 = vmatpush.msra.mxu1 %v24_v0  ;;  %109 = vmatpush.msra.mxu2 %v24_v0  ;;  %v14_v5 = vld [vmem:[%s212_s0] sm:$0xff]  ;;  %v20_v8 = vld [vmem:[%s212_s0 + $0x30] sm:$0x3]  ;;  %v15_v9 = vld [vmem:[%s212_s0 + $0x8] sm:$0xff] }
   0x4   :  { %113 = vmatpush.msra.mxu3 %v23_v1  ;;  %64 = vmatpush.msra.mxu0 %v23_v1  ;;  %v18_v7 = vld [vmem:[%s212_s0 + $0x20] sm:$0xff]  ;;  %v17_v10 = vld [vmem:[%s212_s0 + $0x18] sm:$0xff] }
   0x5   :  { %111 = vmatpush.msra.mxu1 %v23_v1  ;;  %112 = vmatpush.msra.mxu2 %v23_v1  ;;  %v120_v11 = vld [vmem:[%s213_s2] ss:$0 sm:$0xff] }
   0x6   :  { %116 = vmatpush.msra.mxu3 %v22_v2  ;;  %65 = vmatpush.msra.mxu0 %v22_v2 }
   0x7   :  { %114 = vmatpush.msra.mxu1 %v22_v2  ;;  %115 = vmatpush.msra.mxu2 %v22_v2 }
   0x8   :  { %119 = vmatpush.msra.mxu3 %v21_v3  ;;  %66 = vmatpush.msra.mxu0 %v21_v3 }
   0x9   :  { %106 = vmatmul.msk.f32.vlgmr.msra.gmra.mxu3 %vm29_vm0, %v19_v4  ;;  %117 = vmatpush.msra.mxu1 %v21_v3 }
   0xa   :  { %101 = vmatmul.msk.f32.vlgmr.msra.gmra.mxu0 %vm29_vm0, %v14_v5  ;;  %103 = vmatmul.msk.f32.vlgmr.msra.gmra.mxu1 %vm29_vm0, %v16_v6 }
   0xb   :  { %118 = vmatpush.msra.mxu2 %v21_v3 }
   0xc   :  { %105 = vmatmul.msk.f32.vlgmr.msra.gmra.mxu2 %vm29_vm0, %v18_v7 }
  0x11   :  { %107 = vmatmul.msk.f32.gmra.mxu3 %vm29_vm0, %v20_v8 }
  0x12   :  { %102 = vmatmul.msk.f32.gmra.mxu0 %vm29_vm0, %v15_v9  ;;  %104 = vmatmul.msk.f32.gmra.mxu1 %vm29_vm0, %v17_v10 }
  0x87   :  { %v68_v12 = vpop.f32.mrf.mxu0  ;;  %v74_v13 = vpop.f32.mrf.mxu1 }
  0x88   :  { %v69_v14 = vadd.f32 %v120_v11, %v68_v12  ;;  %v75_v15 = vadd.f32 %v120_v11, %v74_v13 }
  0x8a   :  { %89 = vst.msk [vmem:[%s214_s3] sm:$0xff] %vm29_vm0, %v69_v14 }
  0x8b   :  { %91 = vst.msk [vmem:[%s214_s3 + $0x10] sm:$0xff] %vm29_vm0, %v75_v15 }
  0x8c   :  { %v83_v16 = vpop.f32.mrf.mxu3 }
  0x8d   :  { %v84_v17 = vadd.f32 %v120_v11, %v83_v16 }
  0x8f   :  { %94 = vst.msk [vmem:[%s214_s3 + $0x28] sm:$0xff] %vm29_vm0, %v84_v17  ;;  %v71_v18 = vpop.f32.mrf.mxu0  ;;  %v77_v19 = vpop.f32.mrf.mxu1 }
  0x90   :  { %v72_v20 = vadd.f32 %v120_v11, %v71_v18  ;;  %v78_v21 = vadd.f32 %v120_v11, %v77_v19  ;;  %v80_v22 = vpop.f32.mrf.mxu2 }
  0x91   :  { %v81_v23 = vadd.f32 %v120_v11, %v80_v22 }
  0x92   :  { %90 = vst.msk [vmem:[%s214_s3 + $0x8] sm:$0xff] %vm29_vm0, %v72_v20 }
  0x93   :  { %92 = vst.msk [vmem:[%s214_s3 + $0x18] sm:$0xff] %vm29_vm0, %v78_v21 }
  0x94   :  { %93 = vst.msk [vmem:[%s214_s3 + $0x20] sm:$0xff] %vm29_vm0, %v81_v23  ;;  %v86_v24 = vpop.f32.mrf.mxu3 }
  0x95   :  { %v87_v25 = vadd.f32 %v120_v11, %v86_v24 }
  0x97   :  { %96 = vst.msk [vmem:[%s214_s3 + $0x30] sm:$0x3] %vm95_vm1, %v87_v25 }

</bundles_post_ra>
